<compile_context>
chip_gen: v7x
topology: tpu7x:2x2x1
jax: 0.10.0
libtpu: 0.0.40
codegen_flags: <defaults>
</compile_context>

<pallas_src>
import functools
import math

import jax
import jax.numpy as jnp
import numpy as np
from jax.experimental import pallas as pl
from jax.experimental.pallas import tpu as pltpu

N_EMBED = 3
HEAD_SIZE = N_EMBED
# TODO(synk): the reference module only type-checks for n_heads=1 (proj expects
# head_size inputs, while >1 heads would concatenate to n_heads*head_size); we
# implement the n_heads=1 default.
N_HEADS = 1
SEQ_LEN = 8
BATCH = 2


# ----------------------------------------------------------------------------
# Fused self-attention kernel (one batch row per grid step)
# ----------------------------------------------------------------------------
def _self_attention_kernel(x_ref, mask_ref, wq_ref, bq_ref, wk_ref, bk_ref,
                           wv_ref, bv_ref, wp_ref, bp_ref, o_ref, *, scale):
    x = x_ref[0]                                       # (S, D)
    mask = mask_ref[0]                                 # (mS, S), broadcasts over queries
    q = jnp.dot(x, wq_ref[...], preferred_element_type=jnp.float32) + bq_ref[...]
    k = jnp.dot(x, wk_ref[...], preferred_element_type=jnp.float32) + bk_ref[...]
    v = jnp.dot(x, wv_ref[...], preferred_element_type=jnp.float32) + bv_ref[...]
    w = jax.lax.dot_general(q, k, (((1,), (1,)), ((), ())),
                            preferred_element_type=jnp.float32) * scale
    w = jnp.where(mask == 0.0, jnp.float32(-1000000000.0), w)
    # numerically-stable softmax (matches F.softmax)
    w = w - jnp.max(w, axis=-1, keepdims=True)
    e = jnp.exp(w)
    p = e / jnp.sum(e, axis=-1, keepdims=True)
    # TODO(synk): dropout on attention probabilities / projection output is an
    # identity here (torch.nn.Dropout in eval mode).
    ctx = jnp.dot(p, v, preferred_element_type=jnp.float32)
    o_ref[0] = jnp.dot(ctx, wp_ref[...], preferred_element_type=jnp.float32) + bp_ref[...]


def bert_self_attention(x, mask, params):
    """x: (B, S, D) f32.  mask: (B, S), (B, 1, S) or (B, S, S); 0 == masked key."""
    b, s, d = x.shape
    if mask.ndim == 2:                                 # (B, S) key-validity mask
        mask = mask[:, None, :]
    ms = mask.shape[1]
    mask = mask.astype(jnp.float32)
    scale = 1.0 / math.sqrt(d)                         # reference divides by sqrt(n_embed)

    return pl.pallas_call(
        functools.partial(_self_attention_kernel, scale=scale),
        out_shape=jax.ShapeDtypeStruct((b, s, d), jnp.float32),
        grid=(b,),
        in_specs=[
            pl.BlockSpec((1, s, d), lambda i: (i, 0, 0)),
            pl.BlockSpec((1, ms, s), lambda i: (i, 0, 0)),
            pl.BlockSpec((d, HEAD_SIZE), lambda i: (0, 0)),
            pl.BlockSpec((1, HEAD_SIZE), lambda i: (0, 0)),
            pl.BlockSpec((d, HEAD_SIZE), lambda i: (0, 0)),
            pl.BlockSpec((1, HEAD_SIZE), lambda i: (0, 0)),
            pl.BlockSpec((d, HEAD_SIZE), lambda i: (0, 0)),
            pl.BlockSpec((1, HEAD_SIZE), lambda i: (0, 0)),
            pl.BlockSpec((HEAD_SIZE, d), lambda i: (0, 0)),
            pl.BlockSpec((1, d), lambda i: (0, 0)),
        ],
        out_specs=pl.BlockSpec((1, s, d), lambda i: (i, 0, 0)),
        compiler_params=pltpu.CompilerParams(dimension_semantics=("parallel",)),
    )(x, mask,
      params["q_w"], params["q_b"].reshape(1, -1),
      params["k_w"], params["k_b"].reshape(1, -1),
      params["v_w"], params["v_b"].reshape(1, -1),
      params["proj_w"], params["proj_b"].reshape(1, -1))


# ----------------------------------------------------------------------------
# Parameters (torch.nn.Linear default init, deterministic)
# ----------------------------------------------------------------------------
def _init_linear(key, fan_in, fan_out):
    kw, kb = jax.random.split(key)
    bound = 1.0 / math.sqrt(fan_in)
    w = jax.random.uniform(kw, (fan_in, fan_out), jnp.float32, -bound, bound)
    b = jax.random.uniform(kb, (fan_out,), jnp.float32, -bound, bound)
    return w, b


def make_params(key):
    ks = jax.random.split(key, 4)
    p = {}
    p["q_w"], p["q_b"] = _init_linear(ks[0], N_EMBED, HEAD_SIZE)
    p["k_w"], p["k_b"] = _init_linear(ks[1], N_EMBED, HEAD_SIZE)
    p["v_w"], p["v_b"] = _init_linear(ks[2], N_EMBED, HEAD_SIZE)
    p["proj_w"], p["proj_b"] = _init_linear(ks[3], HEAD_SIZE, N_EMBED)
    return p


# ----------------------------------------------------------------------------
# Pure-JAX reference (same math as the PyTorch module in eval mode)
# ----------------------------------------------------------------------------
def reference_self_attention(x, mask, params):
    if mask.ndim == 2:
        mask = mask[:, None, :]
    q = x @ params["q_w"] + params["q_b"]
    k = x @ params["k_w"] + params["k_b"]
    v = x @ params["v_w"] + params["v_b"]
    w = jnp.einsum("bqd,bkd->bqk", q, k) / math.sqrt(x.shape[-1])
    w = jnp.where(mask == 0, -1000000000.0, w)
    scores = jax.nn.softmax(w, axis=-1)
    ctx = scores @ v
    return ctx @ params["proj_w"] + params["proj_b"]


if __name__ == "__main__":
    key = jax.random.PRNGKey(0)
    k_x, k_p = jax.random.split(key)

    x = jax.random.normal(k_x, (BATCH, SEQ_LEN, N_EMBED), jnp.float32)
    # key-padding style mask: 0 marks masked-out key positions
    mask = jnp.array([[1, 1, 1, 1, 1, 1, 0, 0],
                      [1, 1, 1, 1, 1, 1, 1, 0]], jnp.float32)[:, None, :]
    params = make_params(k_p)

    fwd = jax.jit(bert_self_attention)
    out = fwd(x, mask, params)
    out = jax.block_until_ready(out)

    assert out.shape == (BATCH, SEQ_LEN, N_EMBED), out.shape
    ref = reference_self_attention(x, mask, params)
    np.testing.assert_allclose(np.asarray(out), np.asarray(ref), rtol=1e-4, atol=1e-5)
    print("KERNEL_OK")
</pallas_src>

<mosaic_0001>
module attributes {stable_mosaic.version = 11 : i64} {
  func.func @_self_attention_kernel(%arg0: i32, %arg1: memref<1x8x3xf32, #tpu.memory_space<vmem>>, %arg2: memref<1x1x8xf32, #tpu.memory_space<vmem>>, %arg3: memref<3x3xf32, #tpu.memory_space<vmem>>, %arg4: memref<1x3xf32, #tpu.memory_space<vmem>>, %arg5: memref<3x3xf32, #tpu.memory_space<vmem>>, %arg6: memref<1x3xf32, #tpu.memory_space<vmem>>, %arg7: memref<3x3xf32, #tpu.memory_space<vmem>>, %arg8: memref<1x3xf32, #tpu.memory_space<vmem>>, %arg9: memref<3x3xf32, #tpu.memory_space<vmem>>, %arg10: memref<1x3xf32, #tpu.memory_space<vmem>>, %arg11: memref<1x8x3xf32, #tpu.memory_space<vmem>>) attributes {dimension_semantics = [#tpu.dimension_semantics<parallel>], iteration_bounds = array<i64: 2>, scalar_prefetch = 0 : i64, scratch_operands = 0 : i64, tpu.core_type = #tpu.core_type<tc>, window_params = [{transform_indices = @transform_0, window_bounds = array<i64: 1, 8, 3>}, {transform_indices = @transform_1, window_bounds = array<i64: 1, 1, 8>}, {pipeline_mode = #tpu.pipeline_mode<synchronous>, transform_indices = @transform_2, window_bounds = array<i64: 3, 3>}, {pipeline_mode = #tpu.pipeline_mode<synchronous>, transform_indices = @transform_3, window_bounds = array<i64: 1, 3>}, {pipeline_mode = #tpu.pipeline_mode<synchronous>, transform_indices = @transform_4, window_bounds = array<i64: 3, 3>}, {pipeline_mode = #tpu.pipeline_mode<synchronous>, transform_indices = @transform_5, window_bounds = array<i64: 1, 3>}, {pipeline_mode = #tpu.pipeline_mode<synchronous>, transform_indices = @transform_6, window_bounds = array<i64: 3, 3>}, {pipeline_mode = #tpu.pipeline_mode<synchronous>, transform_indices = @transform_7, window_bounds = array<i64: 1, 3>}, {pipeline_mode = #tpu.pipeline_mode<synchronous>, transform_indices = @transform_8, window_bounds = array<i64: 3, 3>}, {pipeline_mode = #tpu.pipeline_mode<synchronous>, transform_indices = @transform_9, window_bounds = array<i64: 1, 3>}, {transform_indices = @transform_10, window_bounds = array<i64: 1, 8, 3>}]} {
    %c0 = arith.constant 0 : index
    %c0_0 = arith.constant 0 : index
    %c0_1 = arith.constant 0 : index
    %0 = vector.load %arg1[%c0, %c0_0, %c0_1] : memref<1x8x3xf32, #tpu.memory_space<vmem>>, vector<1x8x3xf32>
    %1 = vector.shape_cast %0 : vector<1x8x3xf32> to vector<8x3xf32>
    %c0_2 = arith.constant 0 : index
    %c0_3 = arith.constant 0 : index
    %c0_4 = arith.constant 0 : index
    %2 = vector.load %arg2[%c0_2, %c0_3, %c0_4] : memref<1x1x8xf32, #tpu.memory_space<vmem>>, vector<1x1x8xf32>
    %3 = vector.shape_cast %2 : vector<1x1x8xf32> to vector<1x8xf32>
    %c0_5 = arith.constant 0 : index
    %c0_6 = arith.constant 0 : index
    %4 = vector.load %arg3[%c0_5, %c0_6] : memref<3x3xf32, #tpu.memory_space<vmem>>, vector<3x3xf32>
    %cst = arith.constant dense<0.000000e+00> : vector<8x3xf32>
    %5 = tpu.matmul %1, %4, %cst {dimension_numbers = #tpu.dot_dimension_numbers<[1], [0], [0], [1], [0, 0, 1, 1], [], []>} : vector<8x3xf32>, vector<3x3xf32>, vector<8x3xf32> -> vector<8x3xf32>
    %c0_7 = arith.constant 0 : index
    %c0_8 = arith.constant 0 : index
    %6 = vector.load %arg4[%c0_7, %c0_8] : memref<1x3xf32, #tpu.memory_space<vmem>>, vector<1x3xf32>
    %7 = vector.broadcast %6 : vector<1x3xf32> to vector<8x3xf32>
    %8 = arith.addf %5, %7 : vector<8x3xf32>
    %c0_9 = arith.constant 0 : index
    %c0_10 = arith.constant 0 : index
    %9 = vector.load %arg5[%c0_9, %c0_10] : memref<3x3xf32, #tpu.memory_space<vmem>>, vector<3x3xf32>
    %cst_11 = arith.constant dense<0.000000e+00> : vector<8x3xf32>
    %10 = tpu.matmul %1, %9, %cst_11 {dimension_numbers = #tpu.dot_dimension_numbers<[1], [0], [0], [1], [0, 0, 1, 1], [], []>} : vector<8x3xf32>, vector<3x3xf32>, vector<8x3xf32> -> vector<8x3xf32>
    %c0_12 = arith.constant 0 : index
    %c0_13 = arith.constant 0 : index
    %11 = vector.load %arg6[%c0_12, %c0_13] : memref<1x3xf32, #tpu.memory_space<vmem>>, vector<1x3xf32>
    %12 = vector.broadcast %11 : vector<1x3xf32> to vector<8x3xf32>
    %13 = arith.addf %10, %12 : vector<8x3xf32>
    %c0_14 = arith.constant 0 : index
    %c0_15 = arith.constant 0 : index
    %14 = vector.load %arg7[%c0_14, %c0_15] : memref<3x3xf32, #tpu.memory_space<vmem>>, vector<3x3xf32>
    %cst_16 = arith.constant dense<0.000000e+00> : vector<8x3xf32>
    %15 = tpu.matmul %1, %14, %cst_16 {dimension_numbers = #tpu.dot_dimension_numbers<[1], [0], [0], [1], [0, 0, 1, 1], [], []>} : vector<8x3xf32>, vector<3x3xf32>, vector<8x3xf32> -> vector<8x3xf32>
    %c0_17 = arith.constant 0 : index
    %c0_18 = arith.constant 0 : index
    %16 = vector.load %arg8[%c0_17, %c0_18] : memref<1x3xf32, #tpu.memory_space<vmem>>, vector<1x3xf32>
    %17 = vector.broadcast %16 : vector<1x3xf32> to vector<8x3xf32>
    %18 = arith.addf %15, %17 : vector<8x3xf32>
    %cst_19 = arith.constant dense<0.000000e+00> : vector<8x8xf32>
    %19 = tpu.matmul %8, %13, %cst_19 {dimension_numbers = #tpu.dot_dimension_numbers<[1], [1], [0], [0], [0, 0, 1, 0], [], []>} : vector<8x3xf32>, vector<8x3xf32>, vector<8x8xf32> -> vector<8x8xf32>
    %cst_20 = arith.constant 0.577350259 : f32
    %20 = vector.broadcast %cst_20 : f32 to vector<8x8xf32>
    %21 = arith.mulf %19, %20 : vector<8x8xf32>
    %cst_21 = arith.constant 0.000000e+00 : f32
    %22 = vector.broadcast %cst_21 : f32 to vector<1x8xf32>
    %23 = arith.cmpf oeq, %3, %22 : vector<1x8xf32>
    %cst_22 = arith.constant -1.000000e+09 : f32
    %24 = vector.shape_cast %23 : vector<1x8xi1> to vector<1x8xi1>
    %25 = vector.broadcast %24 : vector<1x8xi1> to vector<8x8xi1>
    %26 = vector.broadcast %cst_22 : f32 to vector<8x8xf32>
    %27 = arith.select %25, %26, %21 : vector<8x8xi1>, vector<8x8xf32>
    %cst_23 = arith.constant dense<0xFF800000> : vector<8xf32>
    %28 = vector.multi_reduction <maximumf>, %27, %cst_23 [1] : vector<8x8xf32> to vector<8xf32>
    %29 = vector.shape_cast %28 : vector<8xf32> to vector<8x1xf32>
    %30 = vector.broadcast %29 : vector<8x1xf32> to vector<8x8xf32>
    %31 = arith.subf %27, %30 : vector<8x8xf32>
    %32 = math.exp %31 : vector<8x8xf32>
    %cst_24 = arith.constant dense<0.000000e+00> : vector<8xf32>
    %33 = vector.multi_reduction <add>, %32, %cst_24 [1] : vector<8x8xf32> to vector<8xf32>
    %34 = vector.shape_cast %33 : vector<8xf32> to vector<8x1xf32>
    %35 = vector.broadcast %34 : vector<8x1xf32> to vector<8x8xf32>
    %36 = arith.divf %32, %35 : vector<8x8xf32>
    %cst_25 = arith.constant dense<0.000000e+00> : vector<8x3xf32>
    %37 = tpu.matmul %36, %18, %cst_25 {dimension_numbers = #tpu.dot_dimension_numbers<[1], [0], [0], [1], [0, 0, 1, 1], [], []>} : vector<8x8xf32>, vector<8x3xf32>, vector<8x3xf32> -> vector<8x3xf32>
    %c0_26 = arith.constant 0 : index
    %c0_27 = arith.constant 0 : index
    %38 = vector.load %arg9[%c0_26, %c0_27] : memref<3x3xf32, #tpu.memory_space<vmem>>, vector<3x3xf32>
    %cst_28 = arith.constant dense<0.000000e+00> : vector<8x3xf32>
    %39 = tpu.matmul %37, %38, %cst_28 {dimension_numbers = #tpu.dot_dimension_numbers<[1], [0], [0], [1], [0, 0, 1, 1], [], []>} : vector<8x3xf32>, vector<3x3xf32>, vector<8x3xf32> -> vector<8x3xf32>
    %c0_29 = arith.constant 0 : index
    %c0_30 = arith.constant 0 : index
    %40 = vector.load %arg10[%c0_29, %c0_30] : memref<1x3xf32, #tpu.memory_space<vmem>>, vector<1x3xf32>
    %41 = vector.broadcast %40 : vector<1x3xf32> to vector<8x3xf32>
    %42 = arith.addf %39, %41 : vector<8x3xf32>
    %c0_31 = arith.constant 0 : index
    %c0_32 = arith.constant 0 : index
    %c0_33 = arith.constant 0 : index
    %43 = vector.load %arg11[%c0_31, %c0_32, %c0_33] : memref<1x8x3xf32, #tpu.memory_space<vmem>>, vector<1x8x3xf32>
    %44 = vector.shape_cast %43 : vector<1x8x3xf32> to vector<8x3xf32>
    %45 = vector.shape_cast %42 : vector<8x3xf32> to vector<1x8x3xf32>
    tpu.vector_store %arg11[%c0_31, %c0_32, %c0_33], %45 {strides = array<i32>} : memref<1x8x3xf32, #tpu.memory_space<vmem>>, vector<1x8x3xf32>,
    return
  }
  func.func @transform_0(%arg0: i32) -> (i32, i32, i32) {
    %c0_i32 = arith.constant 0 : i32
    %c0_i32_0 = arith.constant 0 : i32
    %c0_i32_1 = arith.constant 0 : i32
    return %arg0, %c0_i32, %c0_i32_0 : i32, i32, i32
  }
  func.func @transform_1(%arg0: i32) -> (i32, i32, i32) {
    %c0_i32 = arith.constant 0 : i32
    %c0_i32_0 = arith.constant 0 : i32
    %c0_i32_1 = arith.constant 0 : i32
    return %arg0, %c0_i32, %c0_i32_0 : i32, i32, i32
  }
  func.func @transform_2(%arg0: i32) -> (i32, i32) {
    %c0_i32 = arith.constant 0 : i32
    %c0_i32_0 = arith.constant 0 : i32
    %c0_i32_1 = arith.constant 0 : i32
    return %c0_i32, %c0_i32_0 : i32, i32
  }
  func.func @transform_3(%arg0: i32) -> (i32, i32) {
    %c0_i32 = arith.constant 0 : i32
    %c0_i32_0 = arith.constant 0 : i32
    %c0_i32_1 = arith.constant 0 : i32
    return %c0_i32, %c0_i32_0 : i32, i32
  }
  func.func @transform_4(%arg0: i32) -> (i32, i32) {
    %c0_i32 = arith.constant 0 : i32
    %c0_i32_0 = arith.constant 0 : i32
    %c0_i32_1 = arith.constant 0 : i32
    return %c0_i32, %c0_i32_0 : i32, i32
  }
  func.func @transform_5(%arg0: i32) -> (i32, i32) {
    %c0_i32 = arith.constant 0 : i32
    %c0_i32_0 = arith.constant 0 : i32
    %c0_i32_1 = arith.constant 0 : i32
    return %c0_i32, %c0_i32_0 : i32, i32
  }
  func.func @transform_6(%arg0: i32) -> (i32, i32) {
    %c0_i32 = arith.constant 0 : i32
    %c0_i32_0 = arith.constant 0 : i32
    %c0_i32_1 = arith.constant 0 : i32
    return %c0_i32, %c0_i32_0 : i32, i32
  }
  func.func @transform_7(%arg0: i32) -> (i32, i32) {
    %c0_i32 = arith.constant 0 : i32
    %c0_i32_0 = arith.constant 0 : i32
    %c0_i32_1 = arith.constant 0 : i32
    return %c0_i32, %c0_i32_0 : i32, i32
  }
  func.func @transform_8(%arg0: i32) -> (i32, i32) {
    %c0_i32 = arith.constant 0 : i32
    %c0_i32_0 = arith.constant 0 : i32
    %c0_i32_1 = arith.constant 0 : i32
    return %c0_i32, %c0_i32_0 : i32, i32
  }
  func.func @transform_9(%arg0: i32) -> (i32, i32) {
    %c0_i32 = arith.constant 0 : i32
    %c0_i32_0 = arith.constant 0 : i32
    %c0_i32_1 = arith.constant 0 : i32
    return %c0_i32, %c0_i32_0 : i32, i32
  }
  func.func @transform_10(%arg0: i32) -> (i32, i32, i32) {
    %c0_i32 = arith.constant 0 : i32
    %c0_i32_0 = arith.constant 0 : i32
    %c0_i32_1 = arith.constant 0 : i32
    return %arg0, %c0_i32, %c0_i32_0 : i32, i32, i32
  }
}

</mosaic_0001>

<bundles_post_ra>
// kernel: bert_self_attention.1
= control target key start
LH: loop header
LB: loop body
LE: loop exit
PB: predicated region body
PF: predicated region fallthrough
CT: control target
= control target key end

     0   :  { %s1083_s13 = smov 0   ;;  %s1155_s0 = inlined_call_operand.vmem [shape: f32[2,8,3], index: 0, kind: input, shape index: {}]   ;;  %s1156_s1 = inlined_call_operand.vmem [shape: f32[2,1,8], index: 1, kind: input, shape index: {}]   ;;  %s1157_s2 = inlined_call_operand.vmem [shape: f32[3,3], index: 2, kind: input, shape index: {}]   ;;  %s1158_s3 = inlined_call_operand.vmem [shape: f32[1,3], index: 3, kind: input, shape index: {}]   ;;  %s1159_s4 = inlined_call_operand.vmem [shape: f32[3,3], index: 4, kind: input, shape index: {}]   ;;  %s1160_s5 = inlined_call_operand.vmem [shape: f32[1,3], index: 5, kind: input, shape index: {}]   ;;  %s1161_s6 = inlined_call_operand.vmem [shape: f32[3,3], index: 6, kind: input, shape index: {}]   ;;  %s1162_s7 = inlined_call_operand.vmem [shape: f32[1,3], index: 7, kind: input, shape index: {}]   ;;  %s1163_s8 = inlined_call_operand.vmem [shape: f32[3,3], index: 8, kind: input, shape index: {}]   ;;  %s1164_s9 = inlined_call_operand.vmem [shape: f32[1,3], index: 9, kind: input, shape index: {}]   ;;  %s1165_s10 = inlined_call_operand.vmem [shape: f32[2,8,3], index: 10, kind: output, shape index: {}]  }
   0x1 LB: > { %s936_s14 = sadd.s32 4294967295, %s1023_s13   ;;  %p940_p0 = scmp.ge.s32.totalorder %s1023_s13, 1  ;;  %s1023_s13 = sphi %s1083_s13, %s20_s13  }
   0x2   : > { %p319_p1 = scmp.lt.s32.totalorder %s1023_s13, 3 }
   0x4   : > { %p320_p2 = pnand %p940_p0, %p319_p1 }
   0x5   : > { %vm383_vm0 = vcmask (!%p320_p2), 1042432   ;;  %v457_v0 = vld [vmem:[%s1159_s4] sm:$0x7] (!%p320_p2)  ;;  %p358_p3 = scmp.lt.s32.totalorder (!%p320_p2), %s936_s14, 1  ;;  %v1025_v1 = vmov (!%p320_p2), 0.0   ;;  %vm1026_vm1 = vmmov (!%p320_p2), 0   ;;  %v698_v13 = vlaneseq (!%p320_p2) }
   0x6   : > { %323 = sbr.rel (%p320_p2) target bundleno = 1190 (0x4a6), region = 60  ;;  %977 = vmatprep.subr.mxu1 (!%p320_p2), %v1025_v1  ;;  %979 = vmatprep.mubr.msk.f32.mxu1 (!%p320_p2), %vm1026_vm1, %v1025_v1  ;;  %v371_v2 = vld [vmem:[%s1157_s2] sm:$0x7] (!%p320_p2)  ;;  %vm379_vm2 = vcmask (!%p320_p2), 23552   ;;  %v1027_v17 = vmov (!%p320_p2), 0   ;;  %vm704_vm5 = vcmask (!%p320_p2), 64512  }
   0x7   : > { %978 = vmatpush3.msk.msra.mxu1 (!%p320_p2), %vm383_vm0, %v457_v0  ;;  %972 = vmatprep.subr.mxu0 (!%p320_p2), %v1025_v1  ;;  %v946_v4 = vld [vmem:[%s1160_s5] ss:$0 sm:$0xff] (!%p320_p2)  ;;  %v699_v15 = vshrl.u32 (!%p320_p2), %v698_v13, 7 }
   0x8   : > { %973 = vmatpush3.msk.msra.mxu0 (!%p320_p2), %vm383_vm0, %v371_v2  ;;  %974 = vmatprep.mubr.msk.f32.mxu0 (!%p320_p2), %vm1026_vm1, %v1025_v1  ;;  %v943_v5 = vld [vmem:[%s1158_s3] ss:$0 sm:$0xff] (!%p320_p2) }
   0x9   : > { %987 = vmatprep.subr.mxu1 (!%p320_p2), %v1025_v1  ;;  %982 = vmatprep.subr.mxu0 (!%p320_p2), %v1025_v1  ;;  %v538_v12 = vld [vmem:[%s1161_s6] sm:$0x7] (!%p320_p2)  ;;  %v700_v16 = vsub.s32 (!%p320_p2), 0, %v699_v15 }
   0xa   : > { %v949_v31 = vld [vmem:[%s1162_s7] ss:$0 sm:$0xff] (!%p320_p2) }
   0xb   : > { %v789_v34 = vld [vmem:[%s1163_s8] sm:$0x7] (!%p320_p2) }
   0xc   : > { %v955_v40 = vld [vmem:[%s1164_s9] ss:$0 sm:$0xff] (!%p320_p2) }
   0xd   : > { %s1167_s14 = smov (!%p358_p3, %s936_s14), 1 }
   0xe   : > { %s941_s19 = sshll.u32 %s1167_s14, 3  ;;  %s364_s11 = scalar_lea.vmem %s1156_s1, %s1167_s14 }
   0xf   : > { %s361_s22 = scalar_lea.vmem %s1155_s0, %s941_s19  ;;  %v370_v14 = vld [vmem:[%s364_s11] sm:$0x1]  ;;  %s368_s23 = scalar_lea.vmem %s1165_s10, %s941_s19 }
  0x10   : > { %v369_v3 = vld [vmem:[%s361_s22] sm:$0xff]  ;;  %vm696_vm3 = vcmp.eq.f32.partialorder %v370_v14, 0.0 }
  0x11   : > { %980 = vmatmul.mubr.msk.f32.vlgmr.msra.gmra.mrb[0].mxu1 %vm379_vm2, %v369_v3  ;;  %975 = vmatmul.mubr.msk.f32.vlgmr.msra.gmra.mrb[0].mxu0 %vm379_vm2, %v369_v3  ;;  %v697_v18 = vsel %vm696_vm3, 1, %v1027_v17 }
  0x12   : > { %989 = vmatprep.mubr.msk.f32.mxu1 %vm1026_vm1, %v1025_v1  ;;  %984 = vmatprep.mubr.msk.f32.mxu0 %vm1026_vm1, %v1025_v1  ;;  %v701_v19 = vrot.slane %v697_v18, %v700_v16 }
  0x13   : > { %983 = vmatpush3.msk.msra.mxu0 %vm383_vm0, %v538_v12 }
  0x14   : > { %992 = vmatprep.subr.mxu0 %v1025_v1  ;;  %vm702_vm4 = vcmp.eq.s32.totalorder %v701_v19, 1 }
  0x15   : > { %985 = vmatmul.mubr.msk.f32.vlgmr.msra.gmra.mrb[2].mxu0 %vm379_vm2, %v369_v3 }
  0x16   : > { %994 = vmatprep.mubr.msk.f32.mxu0 %vm1026_vm1, %v1025_v1 }
  0xe4   : > { %v534_v6 = vpop.f32.mrb[0].mxu1  ;;  %v453_v7 = vpop.f32.mrb[0].mxu0 }
  0xe5   : > { %v535_v8 = vadd.f32 %v946_v4, %v534_v6  ;;  %v981_v9 = vpop.f32.mrb[1].mxu1  ;;  %v976_v10 = vpop.f32.mrb[1].mxu0  ;;  %v454_v11 = vadd.f32 %v943_v5, %v453_v7 }
  0xe7   : > { %988 = vmatpush3.xpose.msk.msra.mxu1 %vm379_vm2, %v535_v8 }
  0xe8   : > { %997 = vmatprep.subr.mxu1 %v1025_v1  ;;  %v615_v30 = vpop.f32.mrb[2].mxu0 }
  0xe9   : > { %v986_v32 = vpop.f32.mrb[3].mxu0  ;;  %v616_v33 = vadd.f32 %v949_v31, %v615_v30 }
  0xea   : > { %990 = vmatmul.mubr.msk.f32.vlgmr.msra.gmra.mrb[2].mxu1 %vm379_vm2, %v454_v11 }
  0xeb   : > { %999 = vmatprep.mubr.msk.f32.mxu1 %vm1026_vm1, %v1025_v1  ;;  %993 = vmatpush3.msra.mxu0 %v616_v33 }
  0xec   : > { %998 = vmatpush3.msk.msra.mxu1 %vm383_vm0, %v789_v34 }
 0x1bd   : > { %v691_v20 = vpop.f32.mrb[2].mxu1 }
 0x1be   : > { %v695_v21 = vmul.f32 0.57735026, %v691_v20  ;;  %v991_v22 = vpop.f32.mrb[3].mxu1 }
 0x1c0   : > { %v703_v23 = vsel %vm702_vm4, -1e+09, %v695_v21 }
 0x1c1   : > { %v705_v24 = vsel %vm704_vm5, %v703_v23, -inf }
 0x1c2   : > { %706 = vmax.xlane.f32.xlu0 %v705_v24 }
 0x24f   : > { %v707_v25 = vpop.xlane.xlu0 %706 }
 0x250   : > { %v708_v26 = vsub.f32 %v703_v23, %v707_v25 }
 0x252   : > { %v709_v27 = vmul.f32 1.442695, %v708_v26 }
 0x254   : > { %1013 = vpow2.f32 %v709_v27 }
 0x25e   : > { %v1014_v28 = vpop.eup %1013 }
 0x25f   : > { %v711_v29 = vsel %vm704_vm5, %v1014_v28, 0.0 }
 0x260   : > { %712 = vadd.xlane.f32.xlu0 %v711_v29 }
 0x2ed   : > { %v713_v35 = vpop.xlane.xlu0 %712 }
 0x2ee   : > { %1015 = vrcp.f32 %v713_v35 }
 0x2f8   : > { %v1016_v36 = vpop.eup %1015 }
 0x2f9   : > { %v715_v37 = vmul.f32 %v1016_v36, %v1014_v28 }
 0x2fb   : > { %995 = vmatmul.mubr.msk.f32.vlgmr.msra.gmra.mrb[4].mxu0 %vm704_vm5, %v715_v37 }
 0x3ce   : > { %v785_v38 = vpop.f32.mrb[4].mxu0 }
 0x3cf   : > { %v996_v39 = vpop.f32.mrb[5].mxu0  ;;  %1000 = vmatmul.mubr.msk.f32.vlgmr.msra.gmra.mrb[4].mxu1 %vm379_vm2, %v785_v38 }
 0x4a2   : > { %v869_v41 = vpop.f32.mrb[4].mxu1 }
 0x4a3   : > { %v870_v42 = vadd.f32 %v955_v40, %v869_v41  ;;  %v1001_v43 = vpop.f32.mrb[5].mxu1 }
 0x4a5   : > { %873 = vst.msk [vmem:[%s368_s23] sm:$0xff] %vm379_vm2, %v870_v42 }
 0x4a6 PF: > { %s20_s13 = sadd.s32 1, %s1023_s13  }
 0x4a7   : > { %p17_p4 = scmp.ge.s32.totalorder %s20_s13, 4  }
 0x4a9   :  { %19 = sbr.rel (!%p17_p4) target bundleno = 1 (0x1), region = 93 }

</bundles_post_ra>
